<compile_context>
chip_gen: v7x
topology: tpu7x:2x2x1
jax: 0.10.0
libtpu: 0.0.40
codegen_flags: <defaults>
</compile_context>

<pallas_src>
import functools
import math

import jax
import jax.numpy as jnp
from jax.experimental import pallas as pl
from jax.experimental.pallas import tpu as pltpu


def _align8(n: int) -> int:
    return ((n + 7) // 8) * 8


def can_kernel(x_ref, p_ref, y_ref, stats_ref):
    """Fused CanModel.forward core (bound_q=None).

    x_ref:     (N, D)      base-dist samples (shared by all ladder levels)
    p_ref:     (P, D)      packed params [s | t | b | W], sections 8-row aligned
    y_ref:     (L, N, D)   sampled_x per ladder level
    stats_ref: (L, N, 3)   columns: [log_probq, log_probp, log_probz]
    """
    L, N, D = y_ref.shape
    t_off = _align8(L)
    b_off = t_off + _align8(L)
    w_off = b_off + 8

    c = 0.5 * D * math.log(2.0 * math.pi)
    logp_const = math.log(3.0 / (8 * 4 ** 6))

    x = x_ref[...]                                   # (N, D)  f32
    s = p_ref[0:L, :]                                # (L, D)  flow log-scales
    t = p_ref[t_off:t_off + L, :]                    # (L, D)  flow shifts
    b = p_ref[b_off:b_off + 1, :]                    # (1, D)  pretrained bias
    W = p_ref[w_off:w_off + D, :]                    # (D, D)  pretrained weight

    # --- model.log_prob(x, ladder): affine flow, all L levels vectorized -----
    z3 = x[None, :, :] * jnp.exp(s)[:, None, :] + t[:, None, :]      # (L, N, D)

    # --- pretrained.log_prob(z_concat): one fused (L*N, D)@(D, D) MXU matmul -
    y2 = jnp.dot(z3.reshape(L * N, D), W,
                 preferred_element_type=jnp.float32) + b             # (L*N, D)
    y3 = y2.reshape(L, N, D)
    y_ref[...] = y3

    # --- per-sample standard-normal log-probs (column-shaped, no relayout) ---
    logz = -0.5 * jnp.sum(z3 * z3, axis=-1, keepdims=True) - c       # (L, N, 1)
    logp = -0.5 * jnp.sum(y3 * y3, axis=-1, keepdims=True) - c       # (L, N, 1)

    # Flow log-det per level; torch: log_probq_l - log_probp_transformed_l
    logdet = jnp.sum(s, axis=-1, keepdims=True)[:, None, :]          # (L, 1, 1)
    logq = logdet - logp                                             # (L, N, 1)

    # Constant log_probp_ls = log(3 / (8 * 4**6)) per sample (matches torch).
    logp_c = jnp.full((L, N, 1), logp_const, jnp.float32)

    stats_ref[...] = jnp.concatenate([logq, logp_c, logz], axis=-1)  # (L, N, 3)


def pack_params(s, t, W, b):
    """Pack the small parameters (s, t, b, W) into one 8-row-aligned slab so the
    kernel sees a single parameter DMA. Pack once per parameter set."""
    L, D = s.shape
    t_off = _align8(L)
    b_off = t_off + _align8(L)
    w_off = b_off + 8
    p = jnp.zeros((w_off + D, D), jnp.float32)
    p = p.at[0:L].set(s)
    p = p.at[t_off:t_off + L].set(t)
    p = p.at[b_off:b_off + 1].set(b.reshape(1, D))
    p = p.at[w_off:w_off + D].set(W)
    return p


@functools.partial(jax.jit, static_argnames=("num_levels",))
def _can_forward_arrays(x, packed, num_levels):
    L = num_levels
    N, D = x.shape
    P = packed.shape[0]

    y, stats = pl.pallas_call(
        can_kernel,
        out_shape=(
            jax.ShapeDtypeStruct((L, N, D), jnp.float32),   # sampled_x per level
            jax.ShapeDtypeStruct((L, N, 3), jnp.float32),   # [logq, logp, logz]
        ),
        grid=(1,),
        in_specs=[
            pl.BlockSpec((N, D), lambda i: (0, 0)),         # x
            pl.BlockSpec((P, D), lambda i: (0, 0)),         # packed params
        ],
        out_specs=(
            pl.BlockSpec((L, N, D), lambda i: (0, 0, 0)),
            pl.BlockSpec((L, N, 3), lambda i: (0, 0, 0)),
        ),
        compiler_params=pltpu.CompilerParams(
            dimension_semantics=("arbitrary",)),
    )(x, packed)
    # TODO(synk): for batched/large-N use add a "parallel" row-tile grid axis
    # over the L*N dimension (2x on v7x dual TensorCores) and size tiles
    # against v7x's 64 MiB VMEM; pointless at L*N=24.
    return y, stats


def can_forward(x, s, t, W, b, idx_ladder):
    """Mirrors CanModel.forward with bound_q=None (plain/param defaults)."""
    L = len(idx_ladder)
    packed = pack_params(s, t, W, b)
    y, stats = _can_forward_arrays(x, packed, L)

    # Interface parity with torch.chunk: split into per-level lists last.
    sampled_x_ls = list(y)                    # L x (N, D)
    log_probq_ls = list(stats[..., 0])        # L x (N,)
    log_probp_ls = list(stats[..., 1])        # L x (N,)
    log_probz_ls = list(stats[..., 2])        # L x (N,)

    # TODO(synk): bound_q / bound_t branch not implemented (bound_q=None default).
    return sampled_x_ls, log_probq_ls, log_probp_ls, log_probz_ls


if __name__ == "__main__":
    key = jax.random.PRNGKey(0)
    k_x, k_s, k_t, k_w, k_b = jax.random.split(key, 5)

    num_samples = 8          # N
    data_shape = 32          # D
    idx_ladder = [1, 2, 3]   # L = 3 ladder levels
    L, N, D = len(idx_ladder), num_samples, data_shape

    # base_dist.sample(num_samples) -- JAX glue (random draw, not kernel work)
    x = jax.random.normal(k_x, (N, D), jnp.float32)

    # Deterministic synthetic parameters for the surrogate sub-models.
    s = 0.05 * jax.random.normal(k_s, (L, D), jnp.float32)   # flow log-scales
    t = 0.10 * jax.random.normal(k_t, (L, D), jnp.float32)   # flow shifts
    W = 0.10 * jax.random.normal(k_w, (D, D), jnp.float32)   # pretrained linear
    b = 0.01 * jax.random.normal(k_b, (1, D), jnp.float32)

    outs = can_forward(x, s, t, W, b, idx_ladder)
    jax.block_until_ready(outs)

    sampled_x_ls, log_probq_ls, log_probp_ls, log_probz_ls = outs
    assert len(sampled_x_ls) == L and sampled_x_ls[0].shape == (N, D)
    assert len(log_probq_ls) == L and log_probq_ls[0].shape == (N,)
    assert len(log_probp_ls) == L and log_probp_ls[0].shape == (N,)
    assert len(log_probz_ls) == L and log_probz_ls[0].shape == (N,)

    # Loose pure-JAX reference check (MXU matmul precision may differ slightly).
    c = 0.5 * D * math.log(2.0 * math.pi)
    z_exp = x[None, :, :] * jnp.exp(s)[:, None, :] + t[:, None, :]
    y_exp = jnp.einsum("lnd,de->lne", z_exp, W,
                       precision=jax.lax.Precision.HIGHEST) + b
    logz_exp = -0.5 * jnp.sum(z_exp * z_exp, axis=-1) - c
    logp_exp = -0.5 * jnp.sum(y_exp * y_exp, axis=-1) - c
    logq_exp = jnp.sum(s, axis=-1, keepdims=True) - logp_exp

    err = max(
        float(jnp.max(jnp.abs(jnp.stack(sampled_x_ls) - y_exp))),
        float(jnp.max(jnp.abs(jnp.stack(log_probz_ls) - logz_exp))),
        float(jnp.max(jnp.abs(jnp.stack(log_probq_ls) - logq_exp))),
        float(jnp.max(jnp.abs(jnp.stack(log_probp_ls)
                              - math.log(3.0 / (8 * 4 ** 6))))),
    )
    assert err < 5e-2, f"max abs error {err}"
    print("KERNEL_OK")
</pallas_src>

<mosaic_0001>
module attributes {stable_mosaic.version = 11 : i64} {
  func.func @can_kernel(%arg0: i32, %arg1: memref<8x32xf32, #tpu.memory_space<vmem>>, %arg2: memref<56x32xf32, #tpu.memory_space<vmem>>, %arg3: memref<3x8x32xf32, #tpu.memory_space<vmem>>, %arg4: memref<3x8x3xf32, #tpu.memory_space<vmem>>) attributes {dimension_semantics = [#tpu.dimension_semantics<arbitrary>], iteration_bounds = array<i64: 1>, scalar_prefetch = 0 : i64, scratch_operands = 0 : i64, tpu.core_type = #tpu.core_type<tc>, window_params = [{pipeline_mode = #tpu.pipeline_mode<synchronous>, transform_indices = @transform_0, window_bounds = array<i64: 8, 32>}, {pipeline_mode = #tpu.pipeline_mode<synchronous>, transform_indices = @transform_1, window_bounds = array<i64: 56, 32>}, {pipeline_mode = #tpu.pipeline_mode<synchronous>, transform_indices = @transform_2, window_bounds = array<i64: 3, 8, 32>}, {pipeline_mode = #tpu.pipeline_mode<synchronous>, transform_indices = @transform_3, window_bounds = array<i64: 3, 8, 3>}]} {
    %c0 = arith.constant 0 : index
    %c0_0 = arith.constant 0 : index
    %0 = vector.load %arg1[%c0, %c0_0] : memref<8x32xf32, #tpu.memory_space<vmem>>, vector<8x32xf32>
    %c0_1 = arith.constant 0 : index
    %c0_2 = arith.constant 0 : index
    %1 = vector.load %arg2[%c0_1, %c0_2] : memref<56x32xf32, #tpu.memory_space<vmem>>, vector<3x32xf32>
    %c8 = arith.constant 8 : index
    %c0_3 = arith.constant 0 : index
    %2 = vector.load %arg2[%c8, %c0_3] : memref<56x32xf32, #tpu.memory_space<vmem>>, vector<3x32xf32>
    %c16 = arith.constant 16 : index
    %c0_4 = arith.constant 0 : index
    %3 = vector.load %arg2[%c16, %c0_4] : memref<56x32xf32, #tpu.memory_space<vmem>>, vector<1x32xf32>
    %c24 = arith.constant 24 : index
    %c0_5 = arith.constant 0 : index
    %4 = vector.load %arg2[%c24, %c0_5] : memref<56x32xf32, #tpu.memory_space<vmem>>, vector<32x32xf32>
    %5 = vector.shape_cast %0 : vector<8x32xf32> to vector<1x8x32xf32>
    %6 = math.exp %1 : vector<3x32xf32>
    %7 = vector.shape_cast %6 : vector<3x32xf32> to vector<3x1x32xf32>
    %8 = vector.broadcast %5 : vector<1x8x32xf32> to vector<3x8x32xf32>
    %9 = vector.broadcast %7 : vector<3x1x32xf32> to vector<3x8x32xf32>
    %10 = arith.mulf %8, %9 : vector<3x8x32xf32>
    %11 = vector.shape_cast %2 : vector<3x32xf32> to vector<3x1x32xf32>
    %12 = vector.broadcast %11 : vector<3x1x32xf32> to vector<3x8x32xf32>
    %13 = arith.addf %10, %12 : vector<3x8x32xf32>
    %14 = vector.shape_cast %13 : vector<3x8x32xf32> to vector<24x32xf32>
    %cst = arith.constant dense<0.000000e+00> : vector<24x32xf32>
    %15 = tpu.matmul %14, %4, %cst {dimension_numbers = #tpu.dot_dimension_numbers<[1], [0], [0], [1], [0, 0, 1, 1], [], []>} : vector<24x32xf32>, vector<32x32xf32>, vector<24x32xf32> -> vector<24x32xf32>
    %16 = vector.broadcast %3 : vector<1x32xf32> to vector<24x32xf32>
    %17 = arith.addf %15, %16 : vector<24x32xf32>
    %18 = vector.shape_cast %17 : vector<24x32xf32> to vector<3x8x32xf32>
    %c0_6 = arith.constant 0 : index
    %c0_7 = arith.constant 0 : index
    %c0_8 = arith.constant 0 : index
    %19 = vector.load %arg3[%c0_6, %c0_7, %c0_8] : memref<3x8x32xf32, #tpu.memory_space<vmem>>, vector<3x8x32xf32>
    tpu.vector_store %arg3[%c0_6, %c0_7, %c0_8], %18 {strides = array<i32>} : memref<3x8x32xf32, #tpu.memory_space<vmem>>, vector<3x8x32xf32>,
    %20 = arith.mulf %13, %13 : vector<3x8x32xf32>
    %cst_9 = arith.constant dense<0.000000e+00> : vector<3x8xf32>
    %21 = vector.multi_reduction <add>, %20, %cst_9 [2] : vector<3x8x32xf32> to vector<3x8xf32>
    %22 = vector.shape_cast %21 : vector<3x8xf32> to vector<3x8x1xf32>
    %cst_10 = arith.constant -5.000000e-01 : f32
    %23 = vector.broadcast %cst_10 : f32 to vector<3x8x1xf32>
    %24 = arith.mulf %23, %22 : vector<3x8x1xf32>
    %cst_11 = arith.constant 29.4060326 : f32
    %25 = vector.broadcast %cst_11 : f32 to vector<3x8x1xf32>
    %26 = arith.subf %24, %25 : vector<3x8x1xf32>
    %27 = arith.mulf %18, %18 : vector<3x8x32xf32>
    %cst_12 = arith.constant dense<0.000000e+00> : vector<3x8xf32>
    %28 = vector.multi_reduction <add>, %27, %cst_12 [2] : vector<3x8x32xf32> to vector<3x8xf32>
    %29 = vector.shape_cast %28 : vector<3x8xf32> to vector<3x8x1xf32>
    %cst_13 = arith.constant -5.000000e-01 : f32
    %30 = vector.broadcast %cst_13 : f32 to vector<3x8x1xf32>
    %31 = arith.mulf %30, %29 : vector<3x8x1xf32>
    %cst_14 = arith.constant 29.4060326 : f32
    %32 = vector.broadcast %cst_14 : f32 to vector<3x8x1xf32>
    %33 = arith.subf %31, %32 : vector<3x8x1xf32>
    %cst_15 = arith.constant dense<0.000000e+00> : vector<3xf32>
    %34 = vector.multi_reduction <add>, %1, %cst_15 [1] : vector<3x32xf32> to vector<3xf32>
    %35 = vector.shape_cast %34 : vector<3xf32> to vector<3x1xf32>
    %36 = vector.shape_cast %35 : vector<3x1xf32> to vector<3x1x1xf32>
    %37 = vector.broadcast %36 : vector<3x1x1xf32> to vector<3x8x1xf32>
    %38 = arith.subf %37, %33 : vector<3x8x1xf32>
    %cst_16 = arith.constant -9.29859542 : f32
    %39 = vector.broadcast %cst_16 : f32 to vector<3x8x1xf32>
    %40 = tpu.concatenate %38, %39, %26 in 2 : vector<3x8x1xf32>, vector<3x8x1xf32>, vector<3x8x1xf32> -> vector<3x8x3xf32>
    %c0_17 = arith.constant 0 : index
    %c0_18 = arith.constant 0 : index
    %c0_19 = arith.constant 0 : index
    %41 = vector.load %arg4[%c0_17, %c0_18, %c0_19] : memref<3x8x3xf32, #tpu.memory_space<vmem>>, vector<3x8x3xf32>
    tpu.vector_store %arg4[%c0_17, %c0_18, %c0_19], %40 {strides = array<i32>} : memref<3x8x3xf32, #tpu.memory_space<vmem>>, vector<3x8x3xf32>,
    return
  }
  func.func @transform_0(%arg0: i32) -> (i32, i32) {
    %c0_i32 = arith.constant 0 : i32
    %c0_i32_0 = arith.constant 0 : i32
    %c0_i32_1 = arith.constant 0 : i32
    return %c0_i32, %c0_i32_0 : i32, i32
  }
  func.func @transform_1(%arg0: i32) -> (i32, i32) {
    %c0_i32 = arith.constant 0 : i32
    %c0_i32_0 = arith.constant 0 : i32
    %c0_i32_1 = arith.constant 0 : i32
    return %c0_i32, %c0_i32_0 : i32, i32
  }
  func.func @transform_2(%arg0: i32) -> (i32, i32, i32) {
    %c0_i32 = arith.constant 0 : i32
    %c0_i32_0 = arith.constant 0 : i32
    %c0_i32_1 = arith.constant 0 : i32
    %c0_i32_2 = arith.constant 0 : i32
    return %c0_i32, %c0_i32_0, %c0_i32_1 : i32, i32, i32
  }
  func.func @transform_3(%arg0: i32) -> (i32, i32, i32) {
    %c0_i32 = arith.constant 0 : i32
    %c0_i32_0 = arith.constant 0 : i32
    %c0_i32_1 = arith.constant 0 : i32
    %c0_i32_2 = arith.constant 0 : i32
    return %c0_i32, %c0_i32_0, %c0_i32_1 : i32, i32, i32
  }
}

</mosaic_0001>

<bundles_post_ra>
// kernel: _can_forward_arrays.1
= control target key start
LH: loop header
LB: loop body
LE: loop exit
PB: predicated region body
PF: predicated region fallthrough
CT: control target
= control target key end

     0   :  { %v374_v3 = vmov 0.0|0.0   ;;  %vm375_vm0 = vmmov 0   ;;  %v376_v7 = vmov 0.0   ;;  %v377_v10 = vmov 1966171168   ;;  %s485_s0 = inlined_call_operand.vmem [shape: f32[8,32], index: 0, kind: input, shape index: {}]   ;;  %s486_s1 = inlined_call_operand.vmem [shape: f32[56,32], index: 1, kind: input, shape index: {}]   ;;  %s487_s2 = inlined_call_operand.hbm [shape: f32[3,8,32], index: 2, kind: output, shape index: {0}]   ;;  %s488_s3 = inlined_call_operand.vmem [shape: f32[3,8,3], index: 3, kind: output, shape index: {1}]  }
   0x1   :  { %v18_v0 = vld [vmem:[%s486_s1 + $0x18] sm:$0xff]  ;;  %v19_v1 = vld [vmem:[%s486_s1 + $0x20] sm:$0xff]  ;;  %v20_v2 = vld [vmem:[%s486_s1 + $0x28] sm:$0xff]  ;;  %331 = vmatprep.subr.bf16.mxu0 %v374_v3  ;;  %337 = vmatprep.subr.bf16.mxu1 %v374_v3  ;;  %v26_v11 = vunpack.c.l.s4 %v377_v10  ;;  %v28_v12 = vlaneseq }
   0x2   :  { %v332_v4 = vpack.c.bf16 %v19_v1, %v18_v0  ;;  %v21_v5 = vld [vmem:[%s486_s1 + $0x30] sm:$0xff]  ;;  %v15_v6 = vld [vmem:[%s486_s1] sm:$0x7]  ;;  %322 = vmatprep.mubr.msk.f32.mxu0 %vm375_vm0, %v376_v7  ;;  %325 = vmatprep.mubr.msk.f32.mxu1 %vm375_vm0, %v376_v7 }
   0x3   :  { %v22_v8 = vmul.f32 1.442695, %v15_v6  ;;  %v335_v9 = vpack.c.bf16 %v21_v5, %v20_v2 }
   0x4   :  { %333 = vmatpush3.bf16.msra.mxu0 %v332_v4  ;;  %339 = vmatpush3.bf16.msra.mxu1 %v332_v4 }
   0x5   :  { %9 = vsyncpa [#allocation3], 0  ;;  %334 = vmatprep.subr.bf16.mxu0 %v374_v3  ;;  %338 = vmatprep.subr.bf16.mxu1 %v374_v3  ;;  %348 = vpow2.f32 %v22_v8  ;;  %v27_v13 = vunpack.c.0.s8 %v26_v11  ;;  %v418_v14 = vshrl.u32 %v28_v12, 7  ;;  %v14_v25 = vld [vmem:[%s485_s0] sm:$0xff]  ;;  %vm112_vm1 = vcmask 261120  }
   0x6   :  { %v296_v15 = vld.sshfl [vmem:[%s486_s1 + $0x8] sm:$0x13 pattern:$0x75316420]  ;;  %vm241_vm2 = vcmask 256000  }
   0x7   :  { %v30_v16 = vsub.s32 %v27_v13, %v418_v14  ;;  %v74_v17 = vcombine.high %v296_v15, %v296_v15  ;;  %v425_v21 = vsub.s32 0, %v418_v14  ;;  %v242_v43 = vsel %vm241_vm2, %v15_v6, 0.0  ;;  %v297_v44 = vld [vmem:[%s486_s1 + $0x10] ss:$0 sm:$0xff]  ;;  %s378_s1 = smov [#allocation2]  }
   0x8   :  { %336 = vmatpush3.bf16.msra.mxu0 %v335_v9  ;;  %340 = vmatpush3.bf16.msra.mxu1 %v335_v9  ;;  %s281_s27 = sshll.u32 %s378_s1, 4  ;;  %s282_s27 = int_to_ptr.vmem [resolvable:$true] %s281_s27 }
   0x9   :  { %v81_v19 = vrot.slane %v296_v15, %v30_v16  ;;  %v88_v24 = vrot.slane %v74_v17, %v30_v16  ;;  %243 = vadd.xlane.f32.xlu1 %v242_v43  ;;  %s350_s28 = scalar_lea.vmem %s282_s27, 384  ;;  %p355_p1 = scmp.lt.s32.totalorder %s282_s27, %s282_s27 }
   0xa   :  { %p351_p0 = scmp.ne.s32.totalorder %s282_s27, %s350_s28  ;;  %p356_p2 = scmp.lt.s32.totalorder %s350_s28, %s350_s28 }
   0xb   :  { %v93_v26 = vrot.slane %v81_v19, %v425_v21  ;;  %v89_v30 = vcombine.high %v81_v19, %v81_v19  ;;  %v97_v33 = vrot.slane %v88_v24, %v425_v21 }
   0xc   :  { %p357_p3 = por %p356_p2, %p355_p1 }
   0xd   :  { %v101_v38 = vrot.slane %v89_v30, %v425_v21 }
   0xe   :  { %p358_p4 = pnand %p357_p3, %p351_p0 }
   0xf   :  { %v349_v18 = vpop.eup %348 }
  0x10   :  { %v31_v20 = vrot.slane %v349_v18, %v30_v16 }
  0x12   :  { %v39_v22 = vrot.slane %v31_v20, %v30_v16  ;;  %v32_v23 = vcombine.high %v31_v20, %v31_v20 }
  0x14   :  { %v51_v27 = vrot.slane %v39_v22, %v425_v21  ;;  %v46_v28 = vrot.slane %v32_v23, %v30_v16  ;;  %v47_v29 = vcombine.high %v39_v22, %v39_v22 }
  0x16   :  { %v63_v31 = vmul.f32 %v51_v27, %v14_v25  ;;  %v55_v32 = vrot.slane %v46_v28, %v425_v21  ;;  %v59_v34 = vrot.slane %v47_v29, %v425_v21 }
  0x18   :  { %v105_v35 = vadd.f32 %v93_v26, %v63_v31  ;;  %v64_v36 = vmul.f32 %v55_v32, %v14_v25  ;;  %v65_v37 = vmul.f32 %v59_v34, %v14_v25 }
  0x1a   :  { %323 = vmatmul.mubr.msk.f32.vlgmr.msra.gmra.mrb[0].mxu0 %vm112_vm1, %v105_v35  ;;  %v106_v39 = vadd.f32 %v97_v33, %v64_v36  ;;  %v107_v40 = vadd.f32 %v101_v38, %v65_v37  ;;  %v205_v41 = vmul.f32 %v105_v35, %v105_v35 }
  0x1c   :  { %326 = vmatmul.mubr.msk.f32.vlgmr.msra.gmra.mrb[0].mxu1 %vm112_vm1, %v106_v39  ;;  %v208_v42 = vsel %vm112_vm1, %v205_v41, 0.0  ;;  %v207_v57 = vmul.f32 %v107_v40, %v107_v40  ;;  %v206_v60 = vmul.f32 %v106_v39, %v106_v39 }
  0x1d   :  { %328 = vmatprep.mubr.msk.f32.mxu1 %vm375_vm0, %v376_v7  ;;  %209 = vadd.xlane.f32.xlu0 %v208_v42 }
  0x1e   :  { %v214_v62 = vsel %vm112_vm1, %v207_v57, 0.0  ;;  %v211_v63 = vsel %vm112_vm1, %v206_v60, 0.0 }
  0x20   :  { %329 = vmatmul.mubr.msk.f32.gmra.mrb[2].mxu1 %vm112_vm1, %v107_v40 }
  0xed   :  { %v188_v45 = vpop.f32.mrb[0].mxu0 }
  0xee   :  { %v189_v46 = vadd.f32 %v297_v44, %v188_v45  ;;  %v324_v47 = vpop.f32.mrb[1].mxu0 }
  0xef   :  { %v193_v48 = vpop.f32.mrb[0].mxu1 }
  0xf0   :  { %202 = vst.msk [vmem:[#allocation2] sm:$0xff] %vm112_vm1, %v189_v46  ;;  %v194_v49 = vadd.f32 %v297_v44, %v193_v48  ;;  %v327_v50 = vpop.f32.mrb[1].mxu1  ;;  %v223_v51 = vmul.f32 %v189_v46, %v189_v46 }
  0xf2   :  { %203 = vst.msk [vmem:[#allocation2 + $0x8] sm:$0xff] %vm112_vm1, %v194_v49  ;;  %v226_v52 = vsel %vm112_vm1, %v223_v51, 0.0  ;;  %v224_v53 = vmul.f32 %v194_v49, %v194_v49 }
  0xf3   :  { %v198_v54 = vpop.f32.mrb[2].mxu1  ;;  %227 = vadd.xlane.f32.xlu0 %v226_v52 }
  0xf4   :  { %v199_v55 = vadd.f32 %v297_v44, %v198_v54  ;;  %v330_v56 = vpop.f32.mrb[3].mxu1  ;;  %v229_v58 = vsel %vm112_vm1, %v224_v53, 0.0 }
  0xf6   :  { %204 = vst.msk [vmem:[#allocation2 + $0x10] sm:$0xff] %vm112_vm1, %v199_v55  ;;  %v225_v59 = vmul.f32 %v199_v55, %v199_v55 }
  0xf7   :  { %230 = vadd.xlane.f32.xlu0 %v229_v58 }
  0xf8   :  { %v232_v61 = vsel %vm112_vm1, %v225_v59, 0.0 }
  0xf9   :  { %233 = vadd.xlane.f32.xlu1 %v232_v61 }
  0xfb   :  { %215 = vadd.xlane.f32.xlu0 %v214_v62 }
  0xfd   :  { %212 = vadd.xlane.f32.xlu1 %v211_v63 }
  0xfe   :  { %361 = shalt.err (!%p358_p4)
}
  0xff   :  { %s362_s4 = scalar_lea.hbm %s487_s2, 384 }
 0x100   :  { %p363_p5 = scmp.ne.s32.totalorder %s487_s2, %s362_s4  ;;  %p366_p6 = scmp.lt.u32.totalorder %s362_s4, %s487_s2 }
 0x102   :  { %p368_p7 = pnand %p366_p6, %p363_p5 }
 0x104   :  { %371 = shalt.err (!%p368_p7)
}
 0x105   :  { %s379_s9 = smov 128   ;;  %s380_s10 = smov 8   ;;  %v210_v0 = vpop.xlane.xlu0 %209  ;;  %v244_v1 = vpop.xlane.xlu1 %243  ;;  %v252_v7 = vsub.s32 1, %v418_v14  ;;  %vm264_vm3 = vcmask 7168   ;;  %v256_v9 = vsub.s32 2, %v418_v14  ;;  %vm268_vm4 = vcmask 15360  }
 0x106   :  { %287 = dma.vmem_to_hbm [thread:$0]  %s282_s27, 384, %s487_s2, [#allocation3], %s379_s9, %s379_s9, %s380_s10   ;;  %v249_v4 = vrot.slane %v244_v1, %v425_v21  ;;  %v217_v5 = vmul.f32 -0.5, %v210_v0  ;;  %vm272_vm5 = vcmask 23552  }
 0x107   :  { %v253_v18 = vrot.slane %v244_v1, %v252_v7  ;;  %v257_v21 = vrot.slane %v244_v1, %v256_v9 }
 0x108   :  { %v301_v12 = vadd.f32 -29.406033, %v217_v5 }
 0x180   :  { %v228_v2 = vpop.xlane.xlu0 %227 }
 0x181   :  { %v235_v3 = vmul.f32 -0.5, %v228_v2 }
 0x183   :  { %v304_v6 = vadd.f32 -29.406033, %v235_v3 }
 0x184   :  { %v231_v8 = vpop.xlane.xlu0 %230 }
 0x185   :  { %v261_v10 = vsub.f32 %v249_v4, %v304_v6  ;;  %v236_v11 = vmul.f32 -0.5, %v231_v8 }
 0x186   :  { %v234_v13 = vpop.xlane.xlu1 %233 }
 0x187   :  { %v265_v15 = vsel %vm264_vm3, %v261_v10, -9.298595  ;;  %v305_v16 = vadd.f32 -29.406033, %v236_v11  ;;  %v237_v17 = vmul.f32 -0.5, %v234_v13 }
 0x188   :  { %v269_v19 = vsel %vm268_vm4, %v265_v15, %v301_v12  ;;  %v216_v20 = vpop.xlane.xlu0 %215 }
 0x189   :  { %v306_v22 = vadd.f32 -29.406033, %v237_v17  ;;  %273 = vst.msk [vmem:[%s488_s3] sm:$0xff] %vm272_vm5, %v269_v19  ;;  %v219_v14 = vmul.f32 -0.5, %v216_v20  ;;  %v262_v23 = vsub.f32 %v253_v18, %v305_v16 }
 0x18a   :  { %v213_v24 = vpop.xlane.xlu1 %212 }
 0x18b   :  { %v263_v25 = vsub.f32 %v257_v21, %v306_v22  ;;  %v303_v26 = vadd.f32 -29.406033, %v219_v14  ;;  %v218_v27 = vmul.f32 -0.5, %v213_v24  ;;  %v266_v30 = vsel %vm264_vm3, %v262_v23, -9.298595 }
 0x18d   :  { %v267_v28 = vsel %vm264_vm3, %v263_v25, -9.298595  ;;  %v302_v29 = vadd.f32 -29.406033, %v218_v27 }
 0x18e   :  { %v271_v31 = vsel %vm268_vm4, %v267_v28, %v303_v26 }
 0x18f   :  { %275 = vst.msk [vmem:[%s488_s3 + $0x10] sm:$0xff] %vm272_vm5, %v271_v31  ;;  %v270_v32 = vsel %vm268_vm4, %v266_v30, %v302_v29 }
 0x190   :  { %274 = vst.msk [vmem:[%s488_s3 + $0x8] sm:$0xff] %vm272_vm5, %v270_v32 }
 0x191   :  { %372 = dma.done.wait [#allocation3], 384  }
 0x192   :  { %373 = vsyncadd [#allocation3], 4294966912 }
 0x193   :  { %295 = vsyncpa [#allocation3], 1 }

</bundles_post_ra>
